<compile_context>
chip_gen: v5e
topology: v5e:2x2
jax: 0.10.0
libtpu: 0.0.40
codegen_flags: <defaults>
</compile_context>

<pallas_src>
import functools
import math

import jax
import jax.numpy as jnp
from jax import lax
from jax.experimental import pallas as pl
from jax.experimental.pallas import tpu as pltpu


def _mha_kernel(q_ref, k_ref, v_ref, wq_ref, wk_ref, wv_ref, wout_ref, bout_ref,
                o_ref, *, B, M, N, h, sk, sv):
    q = q_ref[...]          # (B*M, Dq)
    k = k_ref[...]          # (B*N, Dk)
    v = v_ref[...]          # (B*N, Dv)

    # All-batch, all-head projections: one wide MXU matmul each.
    # Temperature (sqrt(sk), as in the reference) folded into Q once.
    scale = 1.0 / math.sqrt(sk)
    qp = jnp.dot(q, wq_ref[...], preferred_element_type=jnp.float32) * scale  # (B*M, h*sk)
    kp = jnp.dot(k, wk_ref[...], preferred_element_type=jnp.float32)          # (B*N, h*sk)
    vp = jnp.dot(v, wv_ref[...], preferred_element_type=jnp.float32)          # (B*N, h*sv)

    # Logits for every (batch, head) pair, stacked along sublanes (M=8 => aligned tiles),
    # so the softmax below is a single batched pass instead of B*h lane-sparse ones.
    logits_blocks = []
    for b in range(B):
        qb = qp[b * M:(b + 1) * M, :]                                   # (M, h*sk)
        kb = kp[b * N:(b + 1) * N, :]                                   # (N, h*sk)
        for hh in range(h):
            qh = qb[:, hh * sk:(hh + 1) * sk]                           # (M, sk)
            kh = kb[:, hh * sk:(hh + 1) * sk]                           # (N, sk)
            # trans_b contraction directly on the MXU (no K transpose materialized).
            logits_blocks.append(
                lax.dot_general(qh, kh, (((1,), (1,)), ((), ())),
                                preferred_element_type=jnp.float32))    # (M, N)
    logits = jnp.concatenate(logits_blocks, axis=0)                     # (B*h*M, N)

    # One softmax pass for all batches & heads; reciprocal goes to the EUP slot.
    m = jnp.max(logits, axis=-1, keepdims=True)
    e = jnp.exp(logits - m)
    denom = jnp.sum(e, axis=-1, keepdims=True)
    w = e * pl.reciprocal(denom, approx=True)                           # (B*h*M, N)

    # PV + output projection accumulated per head (no lane-axis concat).
    # wout row-slices are sublane-aligned (sv multiple of 8) so slicing is free.
    bias = bout_ref[...]                                                # (1, out)
    out_rows = []
    for b in range(B):
        vb = vp[b * N:(b + 1) * N, :]                                   # (N, h*sv)
        acc = None
        for hh in range(h):
            wh = w[(b * h + hh) * M:(b * h + hh + 1) * M, :]            # (M, N)
            vh = vb[:, hh * sv:(hh + 1) * sv]                           # (N, sv)
            attn_h = jnp.dot(wh, vh, preferred_element_type=jnp.float32)        # (M, sv)
            contrib = jnp.dot(attn_h, wout_ref[hh * sv:(hh + 1) * sv, :],
                              preferred_element_type=jnp.float32)               # (M, out)
            acc = contrib if acc is None else acc + contrib
        out_rows.append(acc + bias)
    # Single (B*M, out) store (sublane concat of aligned (M, out) blocks).
    o_ref[...] = jnp.concatenate(out_rows, axis=0)


def multi_head_attention(q, k, v, wq, wk, wv, wout, bout, *, h, sk, sv):
    """
    Args:
        q: (B, M, Dq), k: (B, N, Dk), v: (B, N, Dv)   float32
        wq: (Dq, h*sk), wk: (Dk, h*sk), wv: (Dv, h*sv)   (nn.Linear weight.T layout)
        wout: (h*sv, out_size), bout: (out_size,)
    Returns:
        (B, M, out_size) float32
    """
    B, M, Dq = q.shape
    _, N, Dk = k.shape
    _, _, Dv = v.shape
    out_size = wout.shape[-1]

    # Flatten batch into rows so projections are single matmuls and the grid collapses.
    q2 = q.reshape(B * M, Dq)
    k2 = k.reshape(B * N, Dk)
    v2 = v.reshape(B * N, Dv)
    bout2d = bout.reshape(1, out_size)

    kernel = functools.partial(_mha_kernel, B=B, M=M, N=N, h=h, sk=sk, sv=sv)

    out = pl.pallas_call(
        kernel,
        out_shape=jax.ShapeDtypeStruct((B * M, out_size), jnp.float32),
        grid_spec=pltpu.PrefetchScalarGridSpec(
            num_scalar_prefetch=0,
            grid=(1,),
            in_specs=[
                pl.BlockSpec((B * M, Dq), lambda i: (0, 0)),            # q (flattened)
                pl.BlockSpec((B * N, Dk), lambda i: (0, 0)),            # k (flattened)
                pl.BlockSpec((B * N, Dv), lambda i: (0, 0)),            # v (flattened)
                pl.BlockSpec((Dq, h * sk), lambda i: (0, 0)),           # wq fused
                pl.BlockSpec((Dk, h * sk), lambda i: (0, 0)),           # wk fused
                pl.BlockSpec((Dv, h * sv), lambda i: (0, 0)),           # wv fused
                pl.BlockSpec((h * sv, out_size), lambda i: (0, 0)),     # wout fused
                pl.BlockSpec((1, out_size), lambda i: (0, 0)),          # bias
            ],
            out_specs=pl.BlockSpec((B * M, out_size), lambda i: (0, 0)),
        ),
        compiler_params=pltpu.CompilerParams(
            dimension_semantics=("arbitrary",)),
    )(q2, k2, v2, wq, wk, wv, wout, bout2d)

    return out.reshape(B, M, out_size)


def _reference(q, k, v, wq, wk, wv, wout, bout, *, h, sk, sv):
    """Pure-JAX reference mirroring the PyTorch module's math."""
    B, M, _ = q.shape
    N = k.shape[1]
    qp = (q @ wq).reshape(B, M, h, sk)
    kp = (k @ wk).reshape(B, N, h, sk)
    vp = (v @ wv).reshape(B, N, h, sv)
    logits = jnp.einsum("bmhs,bnhs->bhmn", qp, kp) / math.sqrt(sk)
    w = jax.nn.softmax(logits, axis=-1)
    attn = jnp.einsum("bhmn,bnhs->bmhs", w, vp).reshape(B, M, h * sv)
    return attn @ wout + bout


if __name__ == "__main__":
    # Module hyper-parameters (small, consistent with the module's __init__):
    B, M, N = 2, 8, 8
    input_sizes = 32          # Dq = Dk = Dv = 32
    h, sk = 4, 16
    sv = sk                   # sv defaults to sk
    out_size = 32

    key = jax.random.PRNGKey(0)
    kq, kk, kv, kwq, kwk, kwv, kwo, kbo = jax.random.split(key, 8)

    q = jax.random.normal(kq, (B, M, input_sizes), dtype=jnp.float32)
    k = jax.random.normal(kk, (B, N, input_sizes), dtype=jnp.float32)
    v = jax.random.normal(kv, (B, N, input_sizes), dtype=jnp.float32)

    # Deterministic synthetic weights in fused (in_features, h*head_dim) layout,
    # i.e. nn.Linear(in, h*sk).weight.T; head hh occupies columns [hh*sk, (hh+1)*sk).
    # Scale ~ 1/sqrt(fan_in), mimicking nn.Linear's default init range;
    # transform_bias=False -> no bias on Q/K/V projections, bias only on w_out.
    s_in = 1.0 / math.sqrt(input_sizes)
    s_hv = 1.0 / math.sqrt(h * sv)
    wq = jax.random.uniform(kwq, (input_sizes, h * sk), jnp.float32, -s_in, s_in)
    wk = jax.random.uniform(kwk, (input_sizes, h * sk), jnp.float32, -s_in, s_in)
    wv = jax.random.uniform(kwv, (input_sizes, h * sv), jnp.float32, -s_in, s_in)
    wout = jax.random.uniform(kwo, (h * sv, out_size), jnp.float32, -s_hv, s_hv)
    bout = jax.random.uniform(kbo, (out_size,), jnp.float32, -s_hv, s_hv)

    # TODO(synk): mask / dropout branches are not implemented (mask=None,
    # p_dropout=None in this configuration; the reference masked_fill is also a
    # no-op since it is not in-place).

    out = multi_head_attention(q, k, v, wq, wk, wv, wout, bout, h=h, sk=sk, sv=sv)
    out = jax.block_until_ready(out)

    ref = _reference(q, k, v, wq, wk, wv, wout, bout, h=h, sk=sk, sv=sv)
    assert out.shape == (B, M, out_size)
    # Slightly relaxed tolerance to cover pl.reciprocal(approx=True).
    assert jnp.allclose(out, ref, atol=2e-3, rtol=2e-3), "mismatch vs reference"

    print("KERNEL_OK")
</pallas_src>

<mosaic_0001>
module attributes {stable_mosaic.version = 11 : i64} {
  func.func @_mha_kernel(%arg0: i32, %arg1: memref<16x32xf32, #tpu.memory_space<vmem>>, %arg2: memref<16x32xf32, #tpu.memory_space<vmem>>, %arg3: memref<16x32xf32, #tpu.memory_space<vmem>>, %arg4: memref<32x64xf32, #tpu.memory_space<vmem>>, %arg5: memref<32x64xf32, #tpu.memory_space<vmem>>, %arg6: memref<32x64xf32, #tpu.memory_space<vmem>>, %arg7: memref<64x32xf32, #tpu.memory_space<vmem>>, %arg8: memref<1x32xf32, #tpu.memory_space<vmem>>, %arg9: memref<16x32xf32, #tpu.memory_space<vmem>>) attributes {dimension_semantics = [#tpu.dimension_semantics<arbitrary>], iteration_bounds = array<i64: 1>, scalar_prefetch = 0 : i64, scratch_operands = 0 : i64, tpu.core_type = #tpu.core_type<tc>, window_params = [{pipeline_mode = #tpu.pipeline_mode<synchronous>, transform_indices = @transform_0, window_bounds = array<i64: 16, 32>}, {pipeline_mode = #tpu.pipeline_mode<synchronous>, transform_indices = @transform_1, window_bounds = array<i64: 16, 32>}, {pipeline_mode = #tpu.pipeline_mode<synchronous>, transform_indices = @transform_2, window_bounds = array<i64: 16, 32>}, {pipeline_mode = #tpu.pipeline_mode<synchronous>, transform_indices = @transform_3, window_bounds = array<i64: 32, 64>}, {pipeline_mode = #tpu.pipeline_mode<synchronous>, transform_indices = @transform_4, window_bounds = array<i64: 32, 64>}, {pipeline_mode = #tpu.pipeline_mode<synchronous>, transform_indices = @transform_5, window_bounds = array<i64: 32, 64>}, {pipeline_mode = #tpu.pipeline_mode<synchronous>, transform_indices = @transform_6, window_bounds = array<i64: 64, 32>}, {pipeline_mode = #tpu.pipeline_mode<synchronous>, transform_indices = @transform_7, window_bounds = array<i64: 1, 32>}, {pipeline_mode = #tpu.pipeline_mode<synchronous>, transform_indices = @transform_8, window_bounds = array<i64: 16, 32>}]} {
    %c0 = arith.constant 0 : index
    %c0_0 = arith.constant 0 : index
    %0 = vector.load %arg1[%c0, %c0_0] : memref<16x32xf32, #tpu.memory_space<vmem>>, vector<16x32xf32>
    %c0_1 = arith.constant 0 : index
    %c0_2 = arith.constant 0 : index
    %1 = vector.load %arg2[%c0_1, %c0_2] : memref<16x32xf32, #tpu.memory_space<vmem>>, vector<16x32xf32>
    %c0_3 = arith.constant 0 : index
    %c0_4 = arith.constant 0 : index
    %2 = vector.load %arg3[%c0_3, %c0_4] : memref<16x32xf32, #tpu.memory_space<vmem>>, vector<16x32xf32>
    %c0_5 = arith.constant 0 : index
    %c0_6 = arith.constant 0 : index
    %3 = vector.load %arg4[%c0_5, %c0_6] : memref<32x64xf32, #tpu.memory_space<vmem>>, vector<32x64xf32>
    %cst = arith.constant dense<0.000000e+00> : vector<16x64xf32>
    %4 = tpu.matmul %0, %3, %cst {dimension_numbers = #tpu.dot_dimension_numbers<[1], [0], [0], [1], [0, 0, 1, 1], [], []>} : vector<16x32xf32>, vector<32x64xf32>, vector<16x64xf32> -> vector<16x64xf32>
    %cst_7 = arith.constant 2.500000e-01 : f32
    %5 = vector.broadcast %cst_7 : f32 to vector<16x64xf32>
    %6 = arith.mulf %4, %5 : vector<16x64xf32>
    %c0_8 = arith.constant 0 : index
    %c0_9 = arith.constant 0 : index
    %7 = vector.load %arg5[%c0_8, %c0_9] : memref<32x64xf32, #tpu.memory_space<vmem>>, vector<32x64xf32>
    %cst_10 = arith.constant dense<0.000000e+00> : vector<16x64xf32>
    %8 = tpu.matmul %1, %7, %cst_10 {dimension_numbers = #tpu.dot_dimension_numbers<[1], [0], [0], [1], [0, 0, 1, 1], [], []>} : vector<16x32xf32>, vector<32x64xf32>, vector<16x64xf32> -> vector<16x64xf32>
    %c0_11 = arith.constant 0 : index
    %c0_12 = arith.constant 0 : index
    %9 = vector.load %arg6[%c0_11, %c0_12] : memref<32x64xf32, #tpu.memory_space<vmem>>, vector<32x64xf32>
    %cst_13 = arith.constant dense<0.000000e+00> : vector<16x64xf32>
    %10 = tpu.matmul %2, %9, %cst_13 {dimension_numbers = #tpu.dot_dimension_numbers<[1], [0], [0], [1], [0, 0, 1, 1], [], []>} : vector<16x32xf32>, vector<32x64xf32>, vector<16x64xf32> -> vector<16x64xf32>
    %11 = vector.extract_strided_slice %6 {offsets = [0, 0], sizes = [8, 64], strides = [1, 1]} : vector<16x64xf32> to vector<8x64xf32>
    %12 = vector.extract_strided_slice %8 {offsets = [0, 0], sizes = [8, 64], strides = [1, 1]} : vector<16x64xf32> to vector<8x64xf32>
    %13 = vector.extract_strided_slice %11 {offsets = [0, 0], sizes = [8, 16], strides = [1, 1]} : vector<8x64xf32> to vector<8x16xf32>
    %14 = vector.extract_strided_slice %12 {offsets = [0, 0], sizes = [8, 16], strides = [1, 1]} : vector<8x64xf32> to vector<8x16xf32>
    %cst_14 = arith.constant dense<0.000000e+00> : vector<8x8xf32>
    %15 = tpu.matmul %13, %14, %cst_14 {dimension_numbers = #tpu.dot_dimension_numbers<[1], [1], [0], [0], [0, 0, 1, 0], [], []>} : vector<8x16xf32>, vector<8x16xf32>, vector<8x8xf32> -> vector<8x8xf32>
    %16 = vector.extract_strided_slice %11 {offsets = [0, 16], sizes = [8, 16], strides = [1, 1]} : vector<8x64xf32> to vector<8x16xf32>
    %17 = vector.extract_strided_slice %12 {offsets = [0, 16], sizes = [8, 16], strides = [1, 1]} : vector<8x64xf32> to vector<8x16xf32>
    %cst_15 = arith.constant dense<0.000000e+00> : vector<8x8xf32>
    %18 = tpu.matmul %16, %17, %cst_15 {dimension_numbers = #tpu.dot_dimension_numbers<[1], [1], [0], [0], [0, 0, 1, 0], [], []>} : vector<8x16xf32>, vector<8x16xf32>, vector<8x8xf32> -> vector<8x8xf32>
    %19 = vector.extract_strided_slice %11 {offsets = [0, 32], sizes = [8, 16], strides = [1, 1]} : vector<8x64xf32> to vector<8x16xf32>
    %20 = vector.extract_strided_slice %12 {offsets = [0, 32], sizes = [8, 16], strides = [1, 1]} : vector<8x64xf32> to vector<8x16xf32>
    %cst_16 = arith.constant dense<0.000000e+00> : vector<8x8xf32>
    %21 = tpu.matmul %19, %20, %cst_16 {dimension_numbers = #tpu.dot_dimension_numbers<[1], [1], [0], [0], [0, 0, 1, 0], [], []>} : vector<8x16xf32>, vector<8x16xf32>, vector<8x8xf32> -> vector<8x8xf32>
    %22 = vector.extract_strided_slice %11 {offsets = [0, 48], sizes = [8, 16], strides = [1, 1]} : vector<8x64xf32> to vector<8x16xf32>
    %23 = vector.extract_strided_slice %12 {offsets = [0, 48], sizes = [8, 16], strides = [1, 1]} : vector<8x64xf32> to vector<8x16xf32>
    %cst_17 = arith.constant dense<0.000000e+00> : vector<8x8xf32>
    %24 = tpu.matmul %22, %23, %cst_17 {dimension_numbers = #tpu.dot_dimension_numbers<[1], [1], [0], [0], [0, 0, 1, 0], [], []>} : vector<8x16xf32>, vector<8x16xf32>, vector<8x8xf32> -> vector<8x8xf32>
    %25 = vector.extract_strided_slice %6 {offsets = [8, 0], sizes = [8, 64], strides = [1, 1]} : vector<16x64xf32> to vector<8x64xf32>
    %26 = vector.extract_strided_slice %8 {offsets = [8, 0], sizes = [8, 64], strides = [1, 1]} : vector<16x64xf32> to vector<8x64xf32>
    %27 = vector.extract_strided_slice %25 {offsets = [0, 0], sizes = [8, 16], strides = [1, 1]} : vector<8x64xf32> to vector<8x16xf32>
    %28 = vector.extract_strided_slice %26 {offsets = [0, 0], sizes = [8, 16], strides = [1, 1]} : vector<8x64xf32> to vector<8x16xf32>
    %cst_18 = arith.constant dense<0.000000e+00> : vector<8x8xf32>
    %29 = tpu.matmul %27, %28, %cst_18 {dimension_numbers = #tpu.dot_dimension_numbers<[1], [1], [0], [0], [0, 0, 1, 0], [], []>} : vector<8x16xf32>, vector<8x16xf32>, vector<8x8xf32> -> vector<8x8xf32>
    %30 = vector.extract_strided_slice %25 {offsets = [0, 16], sizes = [8, 16], strides = [1, 1]} : vector<8x64xf32> to vector<8x16xf32>
    %31 = vector.extract_strided_slice %26 {offsets = [0, 16], sizes = [8, 16], strides = [1, 1]} : vector<8x64xf32> to vector<8x16xf32>
    %cst_19 = arith.constant dense<0.000000e+00> : vector<8x8xf32>
    %32 = tpu.matmul %30, %31, %cst_19 {dimension_numbers = #tpu.dot_dimension_numbers<[1], [1], [0], [0], [0, 0, 1, 0], [], []>} : vector<8x16xf32>, vector<8x16xf32>, vector<8x8xf32> -> vector<8x8xf32>
    %33 = vector.extract_strided_slice %25 {offsets = [0, 32], sizes = [8, 16], strides = [1, 1]} : vector<8x64xf32> to vector<8x16xf32>
    %34 = vector.extract_strided_slice %26 {offsets = [0, 32], sizes = [8, 16], strides = [1, 1]} : vector<8x64xf32> to vector<8x16xf32>
    %cst_20 = arith.constant dense<0.000000e+00> : vector<8x8xf32>
    %35 = tpu.matmul %33, %34, %cst_20 {dimension_numbers = #tpu.dot_dimension_numbers<[1], [1], [0], [0], [0, 0, 1, 0], [], []>} : vector<8x16xf32>, vector<8x16xf32>, vector<8x8xf32> -> vector<8x8xf32>
    %36 = vector.extract_strided_slice %25 {offsets = [0, 48], sizes = [8, 16], strides = [1, 1]} : vector<8x64xf32> to vector<8x16xf32>
    %37 = vector.extract_strided_slice %26 {offsets = [0, 48], sizes = [8, 16], strides = [1, 1]} : vector<8x64xf32> to vector<8x16xf32>
    %cst_21 = arith.constant dense<0.000000e+00> : vector<8x8xf32>
    %38 = tpu.matmul %36, %37, %cst_21 {dimension_numbers = #tpu.dot_dimension_numbers<[1], [1], [0], [0], [0, 0, 1, 0], [], []>} : vector<8x16xf32>, vector<8x16xf32>, vector<8x8xf32> -> vector<8x8xf32>
    %39 = tpu.concatenate %15, %18, %21, %24, %29, %32, %35, %38 in 0 : vector<8x8xf32>, vector<8x8xf32>, vector<8x8xf32>, vector<8x8xf32>, vector<8x8xf32>, vector<8x8xf32>, vector<8x8xf32>, vector<8x8xf32> -> vector<64x8xf32>
    %cst_22 = arith.constant dense<0xFF800000> : vector<64xf32>
    %40 = vector.multi_reduction <maximumf>, %39, %cst_22 [1] : vector<64x8xf32> to vector<64xf32>
    %41 = vector.shape_cast %40 : vector<64xf32> to vector<64x1xf32>
    %42 = vector.broadcast %41 : vector<64x1xf32> to vector<64x8xf32>
    %43 = arith.subf %39, %42 : vector<64x8xf32>
    %44 = math.exp %43 : vector<64x8xf32>
    %cst_23 = arith.constant dense<0.000000e+00> : vector<64xf32>
    %45 = vector.multi_reduction <add>, %44, %cst_23 [1] : vector<64x8xf32> to vector<64xf32>
    %46 = vector.shape_cast %45 : vector<64xf32> to vector<64x1xf32>
    %47 = tpu.reciprocal %46 {approx = true} : vector<64x1xf32> -> vector<64x1xf32>
    %48 = vector.broadcast %47 : vector<64x1xf32> to vector<64x8xf32>
    %49 = arith.mulf %44, %48 : vector<64x8xf32>
    %c0_24 = arith.constant 0 : index
    %c0_25 = arith.constant 0 : index
    %50 = vector.load %arg8[%c0_24, %c0_25] : memref<1x32xf32, #tpu.memory_space<vmem>>, vector<1x32xf32>
    %51 = vector.extract_strided_slice %10 {offsets = [0, 0], sizes = [8, 64], strides = [1, 1]} : vector<16x64xf32> to vector<8x64xf32>
    %52 = vector.extract_strided_slice %49 {offsets = [0, 0], sizes = [8, 8], strides = [1, 1]} : vector<64x8xf32> to vector<8x8xf32>
    %53 = vector.extract_strided_slice %51 {offsets = [0, 0], sizes = [8, 16], strides = [1, 1]} : vector<8x64xf32> to vector<8x16xf32>
    %cst_26 = arith.constant dense<0.000000e+00> : vector<8x16xf32>
    %54 = tpu.matmul %52, %53, %cst_26 {dimension_numbers = #tpu.dot_dimension_numbers<[1], [0], [0], [1], [0, 0, 1, 1], [], []>} : vector<8x8xf32>, vector<8x16xf32>, vector<8x16xf32> -> vector<8x16xf32>
    %c0_27 = arith.constant 0 : index
    %c0_28 = arith.constant 0 : index
    %55 = vector.load %arg7[%c0_27, %c0_28] : memref<64x32xf32, #tpu.memory_space<vmem>>, vector<16x32xf32>
    %cst_29 = arith.constant dense<0.000000e+00> : vector<8x32xf32>
    %56 = tpu.matmul %54, %55, %cst_29 {dimension_numbers = #tpu.dot_dimension_numbers<[1], [0], [0], [1], [0, 0, 1, 1], [], []>} : vector<8x16xf32>, vector<16x32xf32>, vector<8x32xf32> -> vector<8x32xf32>
    %57 = vector.extract_strided_slice %49 {offsets = [8, 0], sizes = [8, 8], strides = [1, 1]} : vector<64x8xf32> to vector<8x8xf32>
    %58 = vector.extract_strided_slice %51 {offsets = [0, 16], sizes = [8, 16], strides = [1, 1]} : vector<8x64xf32> to vector<8x16xf32>
    %cst_30 = arith.constant dense<0.000000e+00> : vector<8x16xf32>
    %59 = tpu.matmul %57, %58, %cst_30 {dimension_numbers = #tpu.dot_dimension_numbers<[1], [0], [0], [1], [0, 0, 1, 1], [], []>} : vector<8x8xf32>, vector<8x16xf32>, vector<8x16xf32> -> vector<8x16xf32>
    %c16 = arith.constant 16 : index
    %c0_31 = arith.constant 0 : index
    %60 = vector.load %arg7[%c16, %c0_31] : memref<64x32xf32, #tpu.memory_space<vmem>>, vector<16x32xf32>
    %cst_32 = arith.constant dense<0.000000e+00> : vector<8x32xf32>
    %61 = tpu.matmul %59, %60, %cst_32 {dimension_numbers = #tpu.dot_dimension_numbers<[1], [0], [0], [1], [0, 0, 1, 1], [], []>} : vector<8x16xf32>, vector<16x32xf32>, vector<8x32xf32> -> vector<8x32xf32>
    %62 = arith.addf %56, %61 : vector<8x32xf32>
    %63 = vector.extract_strided_slice %49 {offsets = [16, 0], sizes = [8, 8], strides = [1, 1]} : vector<64x8xf32> to vector<8x8xf32>
    %64 = vector.extract_strided_slice %51 {offsets = [0, 32], sizes = [8, 16], strides = [1, 1]} : vector<8x64xf32> to vector<8x16xf32>
    %cst_33 = arith.constant dense<0.000000e+00> : vector<8x16xf32>
    %65 = tpu.matmul %63, %64, %cst_33 {dimension_numbers = #tpu.dot_dimension_numbers<[1], [0], [0], [1], [0, 0, 1, 1], [], []>} : vector<8x8xf32>, vector<8x16xf32>, vector<8x16xf32> -> vector<8x16xf32>
    %c32 = arith.constant 32 : index
    %c0_34 = arith.constant 0 : index
    %66 = vector.load %arg7[%c32, %c0_34] : memref<64x32xf32, #tpu.memory_space<vmem>>, vector<16x32xf32>
    %cst_35 = arith.constant dense<0.000000e+00> : vector<8x32xf32>
    %67 = tpu.matmul %65, %66, %cst_35 {dimension_numbers = #tpu.dot_dimension_numbers<[1], [0], [0], [1], [0, 0, 1, 1], [], []>} : vector<8x16xf32>, vector<16x32xf32>, vector<8x32xf32> -> vector<8x32xf32>
    %68 = arith.addf %62, %67 : vector<8x32xf32>
    %69 = vector.extract_strided_slice %49 {offsets = [24, 0], sizes = [8, 8], strides = [1, 1]} : vector<64x8xf32> to vector<8x8xf32>
    %70 = vector.extract_strided_slice %51 {offsets = [0, 48], sizes = [8, 16], strides = [1, 1]} : vector<8x64xf32> to vector<8x16xf32>
    %cst_36 = arith.constant dense<0.000000e+00> : vector<8x16xf32>
    %71 = tpu.matmul %69, %70, %cst_36 {dimension_numbers = #tpu.dot_dimension_numbers<[1], [0], [0], [1], [0, 0, 1, 1], [], []>} : vector<8x8xf32>, vector<8x16xf32>, vector<8x16xf32> -> vector<8x16xf32>
    %c48 = arith.constant 48 : index
    %c0_37 = arith.constant 0 : index
    %72 = vector.load %arg7[%c48, %c0_37] : memref<64x32xf32, #tpu.memory_space<vmem>>, vector<16x32xf32>
    %cst_38 = arith.constant dense<0.000000e+00> : vector<8x32xf32>
    %73 = tpu.matmul %71, %72, %cst_38 {dimension_numbers = #tpu.dot_dimension_numbers<[1], [0], [0], [1], [0, 0, 1, 1], [], []>} : vector<8x16xf32>, vector<16x32xf32>, vector<8x32xf32> -> vector<8x32xf32>
    %74 = arith.addf %68, %73 : vector<8x32xf32>
    %75 = vector.broadcast %50 : vector<1x32xf32> to vector<8x32xf32>
    %76 = arith.addf %74, %75 : vector<8x32xf32>
    %77 = vector.extract_strided_slice %10 {offsets = [8, 0], sizes = [8, 64], strides = [1, 1]} : vector<16x64xf32> to vector<8x64xf32>
    %78 = vector.extract_strided_slice %49 {offsets = [32, 0], sizes = [8, 8], strides = [1, 1]} : vector<64x8xf32> to vector<8x8xf32>
    %79 = vector.extract_strided_slice %77 {offsets = [0, 0], sizes = [8, 16], strides = [1, 1]} : vector<8x64xf32> to vector<8x16xf32>
    %cst_39 = arith.constant dense<0.000000e+00> : vector<8x16xf32>
    %80 = tpu.matmul %78, %79, %cst_39 {dimension_numbers = #tpu.dot_dimension_numbers<[1], [0], [0], [1], [0, 0, 1, 1], [], []>} : vector<8x8xf32>, vector<8x16xf32>, vector<8x16xf32> -> vector<8x16xf32>
    %c0_40 = arith.constant 0 : index
    %c0_41 = arith.constant 0 : index
    %81 = vector.load %arg7[%c0_40, %c0_41] : memref<64x32xf32, #tpu.memory_space<vmem>>, vector<16x32xf32>
    %cst_42 = arith.constant dense<0.000000e+00> : vector<8x32xf32>
    %82 = tpu.matmul %80, %81, %cst_42 {dimension_numbers = #tpu.dot_dimension_numbers<[1], [0], [0], [1], [0, 0, 1, 1], [], []>} : vector<8x16xf32>, vector<16x32xf32>, vector<8x32xf32> -> vector<8x32xf32>
    %83 = vector.extract_strided_slice %49 {offsets = [40, 0], sizes = [8, 8], strides = [1, 1]} : vector<64x8xf32> to vector<8x8xf32>
    %84 = vector.extract_strided_slice %77 {offsets = [0, 16], sizes = [8, 16], strides = [1, 1]} : vector<8x64xf32> to vector<8x16xf32>
    %cst_43 = arith.constant dense<0.000000e+00> : vector<8x16xf32>
    %85 = tpu.matmul %83, %84, %cst_43 {dimension_numbers = #tpu.dot_dimension_numbers<[1], [0], [0], [1], [0, 0, 1, 1], [], []>} : vector<8x8xf32>, vector<8x16xf32>, vector<8x16xf32> -> vector<8x16xf32>
    %c16_44 = arith.constant 16 : index
    %c0_45 = arith.constant 0 : index
    %86 = vector.load %arg7[%c16_44, %c0_45] : memref<64x32xf32, #tpu.memory_space<vmem>>, vector<16x32xf32>
    %cst_46 = arith.constant dense<0.000000e+00> : vector<8x32xf32>
    %87 = tpu.matmul %85, %86, %cst_46 {dimension_numbers = #tpu.dot_dimension_numbers<[1], [0], [0], [1], [0, 0, 1, 1], [], []>} : vector<8x16xf32>, vector<16x32xf32>, vector<8x32xf32> -> vector<8x32xf32>
    %88 = arith.addf %82, %87 : vector<8x32xf32>
    %89 = vector.extract_strided_slice %49 {offsets = [48, 0], sizes = [8, 8], strides = [1, 1]} : vector<64x8xf32> to vector<8x8xf32>
    %90 = vector.extract_strided_slice %77 {offsets = [0, 32], sizes = [8, 16], strides = [1, 1]} : vector<8x64xf32> to vector<8x16xf32>
    %cst_47 = arith.constant dense<0.000000e+00> : vector<8x16xf32>
    %91 = tpu.matmul %89, %90, %cst_47 {dimension_numbers = #tpu.dot_dimension_numbers<[1], [0], [0], [1], [0, 0, 1, 1], [], []>} : vector<8x8xf32>, vector<8x16xf32>, vector<8x16xf32> -> vector<8x16xf32>
    %c32_48 = arith.constant 32 : index
    %c0_49 = arith.constant 0 : index
    %92 = vector.load %arg7[%c32_48, %c0_49] : memref<64x32xf32, #tpu.memory_space<vmem>>, vector<16x32xf32>
    %cst_50 = arith.constant dense<0.000000e+00> : vector<8x32xf32>
    %93 = tpu.matmul %91, %92, %cst_50 {dimension_numbers = #tpu.dot_dimension_numbers<[1], [0], [0], [1], [0, 0, 1, 1], [], []>} : vector<8x16xf32>, vector<16x32xf32>, vector<8x32xf32> -> vector<8x32xf32>
    %94 = arith.addf %88, %93 : vector<8x32xf32>
    %95 = vector.extract_strided_slice %49 {offsets = [56, 0], sizes = [8, 8], strides = [1, 1]} : vector<64x8xf32> to vector<8x8xf32>
    %96 = vector.extract_strided_slice %77 {offsets = [0, 48], sizes = [8, 16], strides = [1, 1]} : vector<8x64xf32> to vector<8x16xf32>
    %cst_51 = arith.constant dense<0.000000e+00> : vector<8x16xf32>
    %97 = tpu.matmul %95, %96, %cst_51 {dimension_numbers = #tpu.dot_dimension_numbers<[1], [0], [0], [1], [0, 0, 1, 1], [], []>} : vector<8x8xf32>, vector<8x16xf32>, vector<8x16xf32> -> vector<8x16xf32>
    %c48_52 = arith.constant 48 : index
    %c0_53 = arith.constant 0 : index
    %98 = vector.load %arg7[%c48_52, %c0_53] : memref<64x32xf32, #tpu.memory_space<vmem>>, vector<16x32xf32>
    %cst_54 = arith.constant dense<0.000000e+00> : vector<8x32xf32>
    %99 = tpu.matmul %97, %98, %cst_54 {dimension_numbers = #tpu.dot_dimension_numbers<[1], [0], [0], [1], [0, 0, 1, 1], [], []>} : vector<8x16xf32>, vector<16x32xf32>, vector<8x32xf32> -> vector<8x32xf32>
    %100 = arith.addf %94, %99 : vector<8x32xf32>
    %101 = vector.broadcast %50 : vector<1x32xf32> to vector<8x32xf32>
    %102 = arith.addf %100, %101 : vector<8x32xf32>
    %103 = tpu.concatenate %76, %102 in 0 : vector<8x32xf32>, vector<8x32xf32> -> vector<16x32xf32>
    %c0_55 = arith.constant 0 : index
    %c0_56 = arith.constant 0 : index
    %104 = vector.load %arg9[%c0_55, %c0_56] : memref<16x32xf32, #tpu.memory_space<vmem>>, vector<16x32xf32>
    tpu.vector_store %arg9[%c0_55, %c0_56], %103 {strides = array<i32>} : memref<16x32xf32, #tpu.memory_space<vmem>>, vector<16x32xf32>,
    return
  }
  func.func @transform_0(%arg0: i32) -> (i32, i32) {
    %c0_i32 = arith.constant 0 : i32
    %c0_i32_0 = arith.constant 0 : i32
    %c0_i32_1 = arith.constant 0 : i32
    return %c0_i32, %c0_i32_0 : i32, i32
  }
  func.func @transform_1(%arg0: i32) -> (i32, i32) {
    %c0_i32 = arith.constant 0 : i32
    %c0_i32_0 = arith.constant 0 : i32
    %c0_i32_1 = arith.constant 0 : i32
    return %c0_i32, %c0_i32_0 : i32, i32
  }
  func.func @transform_2(%arg0: i32) -> (i32, i32) {
    %c0_i32 = arith.constant 0 : i32
    %c0_i32_0 = arith.constant 0 : i32
    %c0_i32_1 = arith.constant 0 : i32
    return %c0_i32, %c0_i32_0 : i32, i32
  }
  func.func @transform_3(%arg0: i32) -> (i32, i32) {
    %c0_i32 = arith.constant 0 : i32
    %c0_i32_0 = arith.constant 0 : i32
    %c0_i32_1 = arith.constant 0 : i32
    return %c0_i32, %c0_i32_0 : i32, i32
  }
  func.func @transform_4(%arg0: i32) -> (i32, i32) {
    %c0_i32 = arith.constant 0 : i32
    %c0_i32_0 = arith.constant 0 : i32
    %c0_i32_1 = arith.constant 0 : i32
    return %c0_i32, %c0_i32_0 : i32, i32
  }
  func.func @transform_5(%arg0: i32) -> (i32, i32) {
    %c0_i32 = arith.constant 0 : i32
    %c0_i32_0 = arith.constant 0 : i32
    %c0_i32_1 = arith.constant 0 : i32
    return %c0_i32, %c0_i32_0 : i32, i32
  }
  func.func @transform_6(%arg0: i32) -> (i32, i32) {
    %c0_i32 = arith.constant 0 : i32
    %c0_i32_0 = arith.constant 0 : i32
    %c0_i32_1 = arith.constant 0 : i32
    return %c0_i32, %c0_i32_0 : i32, i32
  }
  func.func @transform_7(%arg0: i32) -> (i32, i32) {
    %c0_i32 = arith.constant 0 : i32
    %c0_i32_0 = arith.constant 0 : i32
    %c0_i32_1 = arith.constant 0 : i32
    return %c0_i32, %c0_i32_0 : i32, i32
  }
  func.func @transform_8(%arg0: i32) -> (i32, i32) {
    %c0_i32 = arith.constant 0 : i32
    %c0_i32_0 = arith.constant 0 : i32
    %c0_i32_1 = arith.constant 0 : i32
    return %c0_i32, %c0_i32_0 : i32, i32
  }
}

</mosaic_0001>

<bundles_post_ra>
// kernel: tpu_custom_call.1
= control target key start
LH: loop header
LB: loop body
LE: loop exit
PB: predicated region body
PF: predicated region fallthrough
CT: control target
= control target key end

     0   :  { %13 = vsyncpa [#allocation3], 0  ;;  %s1364_s0 = inlined_call_operand.hbm [shape: f32[16,32], index: 0, kind: input, shape index: {}]   ;;  %s1365_s1 = inlined_call_operand.hbm [shape: f32[16,32], index: 1, kind: input, shape index: {}]   ;;  %s1366_s2 = inlined_call_operand.hbm [shape: f32[16,32], index: 2, kind: input, shape index: {}]   ;;  %s1367_s3 = inlined_call_operand.vmem [shape: f32[32,64], index: 3, kind: input, shape index: {}]   ;;  %s1368_s4 = inlined_call_operand.vmem [shape: f32[32,64], index: 4, kind: input, shape index: {}]   ;;  %s1369_s5 = inlined_call_operand.vmem [shape: f32[32,64], index: 5, kind: input, shape index: {}]   ;;  %s1370_s6 = inlined_call_operand.vmem [shape: f32[64,32], index: 6, kind: input, shape index: {}]   ;;  %s1371_s7 = inlined_call_operand.vmem [shape: f32[1,32], index: 7, kind: input, shape index: {}]   ;;  %s1372_s8 = inlined_call_operand.hbm [shape: f32[16,32], index: 8, kind: output, shape index: {}]  }
   0x1   :  { %14 = vsyncpa [#allocation6], 0 }
   0x2   :  { %15 = vsyncpa [#allocation4], 0  ;;  %s33_s29 = sshll.u32 %s1365_s1, 4  ;;  %s1105_s30 = smov [#allocation5]   ;;  %s34_s29 = int_to_ptr.hbm [resolvable:$true] %s33_s29 }
   0x3   :  { %s35_s9 = sshll.u32 %s1105_s30, 4  ;;  %s20_s12 = sshll.u32 %s1364_s0, 4  ;;  %s36_s9 = int_to_ptr.vmem [resolvable:$true] %s35_s9  ;;  %s21_s12 = int_to_ptr.hbm [resolvable:$true] %s20_s12 }
   0x4   :  { %s1106_s13 = smov 128   ;;  %s1107_s14 = smov 8  }
   0x5   :  { %41 = dma.hbm_to_vmem [thread:$0]  %s34_s29, 256, %s36_s9, [#allocation6], %s1106_s13, %s1106_s13, %s1107_s14  }
   0x6   :  { %s1108_s15 = smov [#allocation2]   ;;  %s46_s1 = sshll.u32 %s1366_s2, 4  ;;  %s47_s1 = int_to_ptr.hbm [resolvable:$true] %s46_s1 }
   0x7   :  { %s22_s16 = sshll.u32 %s1108_s15, 4  ;;  %s1109_s0 = smov [#allocation7]   ;;  %s23_s16 = int_to_ptr.vmem [resolvable:$true] %s22_s16 }
   0x8   :  { %28 = dma.hbm_to_vmem [thread:$0]  %s21_s12, 256, %s23_s16, [#allocation3], %s1106_s13, %s1106_s13, %s1107_s14  }
   0x9   :  { %s48_s19 = sshll.u32 %s1109_s0, 4  ;;  %s49_s19 = int_to_ptr.vmem [resolvable:$true] %s48_s19 }
   0xa   :  { %54 = dma.hbm_to_vmem [thread:$0]  %s47_s1, 256, %s49_s19, [#allocation6], %s1106_s13, %s1106_s13, %s1107_s14  }
   0xb   :  { %1099 = dma.done.wait [#allocation3], 256  }
   0xc   :  { %1100 = vsyncadd [#allocation3], 4294967040 }
   0xd   :  { %1101 = dma.done.wait [#allocation6], 512  }
   0xe   :  { %1102 = vsyncadd [#allocation6], 4294966784  ;;  %v122_v0 = vld [vmem:[%s1368_s4 + $0x18] sm:$0xff]  ;;  %v121_v2 = vld [vmem:[%s1368_s4 + $0x10] sm:$0xff]  ;;  %vm87_vm0 = vcmask 261120   ;;  %vm185_vm1 = vcmask 130048  }
   0xf   :  { %v86_v1 = vld [vmem:[%s1367_s3 + $0x18] sm:$0xff]  ;;  %141 = vmatpush.msra.mxu1 %v122_v0  ;;  %v85_v3 = vld [vmem:[%s1367_s3 + $0x10] sm:$0xff]  ;;  %v120_v4 = vld [vmem:[%s1368_s4 + $0x8] sm:$0xff]  ;;  %s1110_s19 = smov 96   ;;  %s1111_s20 = smov 112   ;;  %vm406_vm2 = vcmask 64512  }
  0x10   :  { %106 = vmatpush.msra.mxu0 %v86_v1  ;;  %v84_v5 = vld [vmem:[%s1367_s3 + $0x8] sm:$0xff]  ;;  %v119_v6 = vld [vmem:[%s1368_s4] sm:$0xff]  ;;  %v79_v8 = vld [vmem:[#allocation5] sm:$0xff]  ;;  %s909_s1 = sshll.u32 %s1372_s8, 4  ;;  %s910_s1 = int_to_ptr.hbm [resolvable:$true] %s909_s1 }
  0x11   :  { %142 = vmatpush.msra.mxu1 %v121_v2  ;;  %v83_v7 = vld [vmem:[%s1367_s3] sm:$0xff]  ;;  %v80_v10 = vld [vmem:[#allocation5 + $0x8] sm:$0xff]  ;;  %v78_v11 = vld [vmem:[#allocation2 + $0x8] sm:$0xff]  ;;  %s1113_s3 = smov [#allocation8]  }
  0x12   :  { %107 = vmatpush.msra.mxu0 %v85_v3  ;;  %v77_v9 = vld [vmem:[#allocation2] sm:$0xff]  ;;  %v155_v12 = vld [vmem:[%s1369_s5 + $0x18] sm:$0xff]  ;;  %v154_v13 = vld [vmem:[%s1369_s5 + $0x10] sm:$0xff]  ;;  %s907_s16 = sshll.u32 %s1113_s3, 4  ;;  %s908_s16 = int_to_ptr.vmem [resolvable:$true] %s907_s16 }
  0x13   :  { %143 = vmatpush.msra.mxu1 %v120_v4  ;;  %174 = vmatpush.msra.mxu2 %v155_v12  ;;  %v153_v14 = vld [vmem:[%s1369_s5 + $0x8] sm:$0xff]  ;;  %v152_v15 = vld [vmem:[%s1369_s5] sm:$0xff]  ;;  %s1112_s5 = smov 80  }
  0x14   :  { %108 = vmatpush.msra.mxu0 %v84_v5  ;;  %v81_v16 = vld [vmem:[#allocation7] sm:$0xff]  ;;  %v82_v23 = vld [vmem:[#allocation7 + $0x8] sm:$0xff] }
  0x15   :  { %144 = vmatpush.msra.mxu1 %v119_v6  ;;  %175 = vmatpush.msra.mxu2 %v154_v13 }
  0x16   :  { %109 = vmatpush.msra.mxu0 %v83_v7  ;;  %925 = vmatmul.msk.f32.vlgmr.msra.gmra.mxu1 %vm87_vm0, %v79_v8  ;;  %v1284_v7 = vld [vmem:[%s1370_s6 + $0x8] sm:$0xff] }
  0x17   :  { %923 = vmatmul.msk.f32.vlgmr.msra.gmra.mxu0 %vm87_vm0, %v77_v9  ;;  %176 = vmatpush.msra.mxu2 %v153_v14 }
  0x19   :  { %177 = vmatpush.msra.mxu2 %v152_v15 }
  0x1a   :  { %927 = vmatmul.msk.f32.vlgmr.msra.gmra.mxu2 %vm87_vm0, %v81_v16  ;;  %v623_v16 = vld [vmem:[%s1370_s6 + $0x28] sm:$0xff] }
  0x1e   :  { %926 = vmatmul.msk.f32.gmra.mxu1 %vm87_vm0, %v80_v10  ;;  %v1290_v10 = vld [vmem:[%s1370_s6] sm:$0xff] }
  0x1f   :  { %924 = vmatmul.msk.f32.gmra.mxu0 %vm87_vm0, %v78_v11 }
  0x22   :  { %928 = vmatmul.msk.f32.gmra.mxu2 %vm87_vm0, %v82_v23 }
  0x93   :  { %v146_v17 = vpop.f32.mrf.mxu1 }
  0x94   :  { %v111_v18 = vpop.f32.mrf.mxu0  ;;  %242 = vrot.lane.b32.xlu1 %v146_v17, %s1110_s19  ;;  %214 = vrot.lane.b32.xlu0 %v146_v17, %s1111_s20 }
  0x95   :  { %v1220_v19 = vmul.f32 0.25, %v111_v18  ;;  %929 = vmatpush.xpose.msk.msra.mxu3 %vm185_vm1, %v146_v17 }
  0x98   :  { %930 = vmatmul.msk.f32.vlgmr.msra.gmra.mxu3 %vm185_vm1, %v1220_v19 }
  0x9b   :  { %v149_v20 = vpop.f32.mrf.mxu1 }
  0x9c   :  { %v114_v21 = vpop.f32.mrf.mxu0  ;;  %240 = vrot.lane.b32.xlu1 %v1220_v19, %s1110_s19  ;;  %212 = vrot.lane.b32.xlu0 %v1220_v19, %s1111_s20 }
  0x9d   :  { %324 = vrot.lane.b32.xlu2 %v149_v20, %s1111_s20  ;;  %937 = vmatpush.xpose.msk.msrb.mxu1 %vm185_vm1, %v149_v20  ;;  %v1231_v22 = vmul.f32 0.25, %v114_v21  ;;  %v1243_v29 = vpop.f32.mrf.mxu2 }
  0xa0   :  { %938 = vmatmul.msk.f32.vlgmr.msrb.gmra.mxu1 %vm185_vm1, %v1231_v22 }
  0xa1   :  { %514 = vmatpush.msra.mxu1 %v1243_v29 }
  0xa5   :  { %322 = vrot.lane.b32.xlu2 %v1231_v22, %s1111_s20  ;;  %v1252_v33 = vpop.f32.mrf.mxu2 }
  0xf7   :  { %v325_v24 = vpop.permute.xlu2 %324 }
  0xf8   :  { %939 = vmatpush.xpose.msk.msrb.mxu2 %vm185_vm1, %v325_v24 }
  0xff   :  { %v323_v25 = vpop.permute.xlu2 %322 }
 0x100   :  { %940 = vmatmul.msk.f32.vlgmr.msrb.gmra.mxu2 %vm185_vm1, %v323_v25 }
 0x106   :  { %v243_v26 = vpop.permute.xlu1 %242  ;;  %v215_v27 = vpop.permute.xlu0 %214 }
 0x107   :  { %931 = vmatpush.xpose.msk.msrb.mxu3 %vm185_vm1, %v215_v27 }
 0x10b   :  { %933 = vmatpush.xpose.msk.msra.mxu3 %vm185_vm1, %v243_v26 }
 0x10e   :  { %v213_v28 = vpop.permute.xlu0 %212  ;;  %v241_v30 = vpop.permute.xlu1 %240 }
 0x10f   :  { %932 = vmatmul.msk.f32.vlgmr.msrb.gmra.mxu3 %vm185_vm1, %v213_v28 }
 0x117   :  { %934 = vmatmul.msk.f32.vlgmr.msra.gmra.mxu3 %vm185_vm1, %v241_v30 }
 0x11b   :  { %v209_v31 = vpop.f32.mrf.mxu3 }
 0x11c   :  { %v407_v32 = vsel %vm406_vm2, %v209_v31, -inf }
 0x11d   :  { %408 = vmax.xlane.f32.xlu0 %v407_v32  ;;  %v319_v11 = vpop.f32.mrf.mxu1 }
 0x11e   :  { %v419_v30 = vsel %vm406_vm2, %v319_v11, -inf }
 0x131   :  { %596 = vrot.lane.b32.xlu0 %v1243_v29, %s1110_s19 }
 0x139   :  { %352 = vrot.lane.b32.xlu0 %v149_v20, %s1110_s19 }
 0x141   :  { %380 = vrot.lane.b32.xlu0 %v149_v20, %s1112_s5 }
 0x183   :  { %v347_v34 = vpop.f32.mrf.mxu2 }
 0x184   :  { %v422_v35 = vsel %vm406_vm2, %v347_v34, -inf }
 0x185   :  { %423 = vmax.xlane.f32.xlu0 %v422_v35 }
 0x190   :  { %v409_v36 = vpop.xlane.xlu0 %408 }
 0x191   :  { %v431_v37 = vsub.f32 %v209_v31, %v409_v36 }
 0x192   :  { %v237_v38 = vpop.f32.mrf.mxu3 }
 0x193   :  { %v439_v39 = vmul.f32 1.442695, %v431_v37  ;;  %v410_v46 = vsel %vm406_vm2, %v237_v38, -inf }
 0x195   :  { %971 = vpow2.f32 %v439_v39 }
 0x19a   :  { %v265_v40 = vpop.f32.mrf.mxu3 }
 0x19b   :  { %v972_v41 = vpop.eup %971  ;;  %v413_v42 = vsel %vm406_vm2, %v265_v40, -inf }
 0x19c   :  { %414 = vmax.xlane.f32.xlu1 %v413_v42  ;;  %v455_v43 = vsel %vm406_vm2, %v972_v41, 0.0 }
 0x19d   :  { %456 = vadd.xlane.f32.xlu2 %v455_v43 }
 0x1a3   :  { %v597_v44 = vpop.permute.xlu0 %596 }
 0x1a4   :  { %617 = vmatpush.msrb.mxu1 %v597_v44 }
 0x1ab   :  { %v353_v45 = vpop.permute.xlu0 %352 }
 0x1ac   :  { %941 = vmatpush.xpose.msk.msrb.mxu3 %vm185_vm1, %v353_v45 }
 0x1b3   :  { %v381_v47 = vpop.permute.xlu0 %380 }
 0x1b5   :  { %270 = vrot.lane.b32.xlu1 %v146_v17, %s1112_s5  ;;  %v622_v17 = vld [vmem:[%s1370_s6 + $0x20] sm:$0xff] }
 0x1bd   :  { %350 = vrot.lane.b32.xlu1 %v1231_v22, %s1110_s19 }
 0x1e7   :  { %411 = vmax.xlane.f32.xlu1 %v410_v46 }
 0x1f8   :  { %v424_v48 = vpop.xlane.xlu0 %423 }
 0x1f9   :  { %v436_v49 = vsub.f32 %v347_v34, %v424_v48  ;;  %v548_v34 = vld [vmem:[%s1370_s6 + $0x10] sm:$0xff] }
 0x1fb   :  { %v449_v50 = vmul.f32 1.442695, %v436_v49 }
 0x1fd   :  { %973 = vpow2.f32 %v449_v50 }
 0x200   :  { %522 = vrot.lane.b32.xlu1 %v1243_v29, %s1111_s20 }
 0x203   :  { %v1264_v51 = vpop.eup %973 }
 0x204   :  { %v470_v52 = vsel %vm406_vm2, %v1264_v51, 0.0 }
 0x205   :  { %471 = vadd.xlane.f32.xlu0 %v470_v52 }
 0x20f   :  { %v415_v53 = vpop.xlane.xlu1 %414 }
 0x210   :  { %v433_v54 = vsub.f32 %v265_v40, %v415_v53  ;;  %v457_v55 = vpop.xlane.xlu2 %456 }
 0x211   :  { %975 = vrcp.f32 %v457_v55 }
 0x212   :  { %v443_v56 = vmul.f32 1.442695, %v433_v54 }
 0x214   :  { %977 = vpow2.f32 %v443_v56 }
 0x217   :  { %v976_v57 = vpop.eup %975 }
 0x218   :  { %v487_v58 = vmul.f32 %v976_v57, %v972_v41 }
 0x21a   :  { %v978_v59 = vpop.eup %977  ;;  %945 = vmatmul.msk.f32.vlgmr.msra.gmra.mxu1 %vm406_vm2, %v487_v58 }
 0x21b   :  { %v461_v60 = vsel %vm406_vm2, %v978_v59, 0.0  ;;  %722 = vmatpush.msra.mxu1 %v1252_v33 }
 0x21c   :  { %462 = vadd.xlane.f32.xlu2 %v461_v60 }
 0x227   :  { %v271_v61 = vpop.permute.xlu1 %270 }
 0x228   :  { %935 = vmatpush.xpose.msk.msrb.mxu0 %vm185_vm1, %v271_v61 }
 0x22c   :  { %943 = vmatpush.xpose.msk.msra.mxu0 %vm185_vm1, %v381_v47 }
 0x22f   :  { %v351_v62 = vpop.permute.xlu1 %350 }
 0x230   :  { %942 = vmatmul.msk.f32.vlgmr.msrb.gmra.mxu3 %vm185_vm1, %v351_v62 }
 0x234   :  { %268 = vrot.lane.b32.xlu2 %v1220_v19, %s1112_s5 }
 0x23c   :  { %378 = vrot.lane.b32.xlu2 %v1231_v22, %s1112_s5  ;;  %v1311_v22 = vld [vmem:[%s1370_s6 + $0x18] sm:$0xff] }
 0x23d   :  { %567 = vmatpush.msra.mxu3 %v1311_v22 }
 0x23f   :  { %568 = vmatpush.msra.mxu3 %v548_v34 }
 0x25a   :  { %v412_v63 = vpop.xlane.xlu1 %411 }
 0x25b   :  { %v432_v0 = vsub.f32 %v237_v38, %v412_v63 }
 0x25d   :  { %v441_v1 = vmul.f32 1.442695, %v432_v0 }
 0x25f   :  { %979 = vpow2.f32 %v441_v1 }
 0x265   :  { %v980_v2 = vpop.eup %979 }
 0x266   :  { %v458_v3 = vsel %vm406_vm2, %v980_v2, 0.0 }
 0x267   :  { %459 = vadd.xlane.f32.xlu2 %v458_v3 }
 0x272   :  { %v523_v5 = vpop.permute.xlu1 %522 }
 0x273   :  { %543 = vmatpush.msra.mxu2 %v523_v5 }
 0x275   :  { %641 = vmatpush.msrb.mxu2 %v623_v16 }
 0x277   :  { %642 = vmatpush.msrb.mxu2 %v622_v17 }
 0x278   :  { %v472_v23 = vpop.xlane.xlu0 %471 }
 0x27f   :  { %728 = vrot.lane.b32.xlu2 %v1252_v33, %s1111_s20 }
 0x28f   :  { %v463_v4 = vpop.xlane.xlu2 %462 }
 0x290   :  { %981 = vrcp.f32 %v463_v4 }
 0x296   :  { %v982_v6 = vpop.eup %981 }
 0x297   :  { %v489_v8 = vmul.f32 %v982_v6, %v978_v59  ;;  %v269_v9 = vpop.permute.xlu2 %268  ;;  %v516_v13 = vpop.f32.mrf.mxu1 }
 0x298   :  { %936 = vmatmul.msk.f32.vlgmr.msrb.gmra.mxu0 %vm185_vm1, %v269_v9  ;;  %v674_v9 = vld [vmem:[%s1370_s6 + $0x30] sm:$0xff] }
 0x299   :  { %949 = vmatmul.msk.f32.vlgmr.msrb.gmra.mxu1 %vm406_vm2, %v489_v8  ;;  %590 = vmatpush.msrb.mxu0 %v1284_v7  ;;  %v675_v8 = vld [vmem:[%s1370_s6 + $0x38] sm:$0xff] }
 0x29b   :  { %591 = vmatpush.msrb.mxu0 %v1290_v10 }
 0x29f   :  { %v379_v12 = vpop.permute.xlu2 %378 }
 0x2a0   :  { %944 = vmatmul.msk.f32.vlgmr.msra.gmra.mxu0 %vm185_vm1, %v379_v12 }
 0x2a1   :  { %693 = vmatpush.msra.mxu0 %v675_v8 }
 0x2a3   :  { %694 = vmatpush.msra.mxu0 %v674_v9 }
 0x2a8   :  { %948 = vmatmul.msk.f32.vlgmr.msrb.gmra.mxu0 %vm185_vm1, %v516_v13 }
 0x2a9   :  { %794 = vmatpush.msrb.mxu0 %v1284_v7 }
 0x2ab   :  { %795 = vmatpush.msrb.mxu0 %v1290_v10  ;;  %v970_v10 = vld [vmem:[%s1371_s7] ss:$0 sm:$0xff] }
 0x2b3   :  { %v1297_v14 = vpop.f32.mrf.mxu3 }
 0x2b4   :  { %v425_v15 = vsel %vm406_vm2, %v1297_v14, -inf }
 0x2b5   :  { %426 = vmax.xlane.f32.xlu1 %v425_v15 }
 0x2da   :  { %v460_v18 = vpop.xlane.xlu2 %459 }
 0x2db   :  { %983 = vrcp.f32 %v460_v18 }
 0x2dc   :  { %985 = vrcp.f32 %v472_v23 }
 0x2e1   :  { %v984_v19 = vpop.eup %983 }
 0x2e2   :  { %v488_v20 = vmul.f32 %v984_v19, %v980_v2  ;;  %v729_v21 = vpop.permute.xlu2 %728  ;;  %v986_v27 = vpop.eup %985 }
 0x2e3   :  { %v492_v28 = vmul.f32 %v986_v27, %v1264_v51 }
 0x2e4   :  { %946 = vmatmul.msk.f32.vlgmr.msra.gmra.mxu2 %vm406_vm2, %v488_v20 }
 0x2e5   :  { %749 = vmatpush.msra.mxu2 %v729_v21 }
 0x315   :  { %v293_v24 = vpop.f32.mrf.mxu0 }
 0x316   :  { %v619_v25 = vpop.f32.mrf.mxu1  ;;  %v416_v26 = vsel %vm406_vm2, %v293_v24, -inf }
 0x317   :  { %417 = vmax.xlane.f32.xlu0 %v416_v26  ;;  %950 = vmatmul.msk.f32.vlgmr.msrb.gmra.mxu2 %vm185_vm1, %v619_v25 }
 0x318   :  { %843 = vmatpush.msrb.mxu2 %v623_v16 }
 0x31a   :  { %844 = vmatpush.msrb.mxu2 %v622_v17 }
 0x31d   :  { %v403_v31 = vpop.f32.mrf.mxu0 }
 0x31e   :  { %v428_v32 = vsel %vm406_vm2, %v403_v31, -inf }
 0x31f   :  { %954 = vmatmul.msk.f32.vlgmr.msra.gmra.mxu2 %vm406_vm2, %v492_v28  ;;  %420 = vmax.xlane.f32.xlu0 %v419_v30 }
 0x325   :  { %v593_v17 = vpop.f32.mrf.mxu0 }
 0x327   :  { %429 = vmax.xlane.f32.xlu0 %v428_v32 }
 0x328   :  { %v427_v51 = vpop.xlane.xlu1 %426 }
 0x329   :  { %v437_v52 = vsub.f32 %v1297_v14, %v427_v51 }
 0x32b   :  { %v451_v53 = vmul.f32 1.442695, %v437_v52 }
 0x367   :  { %v545_v35 = vpop.f32.mrf.mxu2 }
 0x368   :  { %947 = vmatmul.msk.f32.vlgmr.msra.gmra.mxu3 %vm185_vm1, %v545_v35 }
 0x38a   :  { %v418_v36 = vpop.xlane.xlu0 %417 }
 0x38b   :  { %v434_v37 = vsub.f32 %v293_v24, %v418_v36 }
 0x38d   :  { %v445_v38 = vmul.f32 1.442695, %v434_v37 }
 0x38f   :  { %987 = vpow2.f32 %v445_v38 }
 0x392   :  { %v421_v39 = vpop.xlane.xlu0 %420 }
 0x393   :  { %v435_v40 = vsub.f32 %v319_v11, %v421_v39 }
 0x395   :  { %v988_v41 = vpop.eup %987  ;;  %v447_v42 = vmul.f32 1.442695, %v435_v40 }
 0x396   :  { %v464_v43 = vsel %vm406_vm2, %v988_v41, 0.0 }
 0x397   :  { %989 = vpow2.f32 %v447_v42  ;;  %465 = vadd.xlane.f32.xlu2 %v464_v43 }
 0x39a   :  { %v430_v44 = vpop.xlane.xlu0 %429 }
 0x39b   :  { %v438_v45 = vsub.f32 %v403_v31, %v430_v44 }
 0x39d   :  { %v990_v46 = vpop.eup %989  ;;  %v453_v47 = vmul.f32 1.442695, %v438_v45 }
 0x39e   :  { %v467_v48 = vsel %vm406_vm2, %v990_v46, 0.0 }
 0x39f   :  { %991 = vpow2.f32 %v453_v47  ;;  %468 = vadd.xlane.f32.xlu0 %v467_v48 }
 0x3a0   :  { %993 = vpow2.f32 %v451_v53 }
 0x3a5   :  { %v992_v49 = vpop.eup %991 }
 0x3a6   :  { %v476_v50 = vsel %vm406_vm2, %v992_v49, 0.0  ;;  %v994_v54 = vpop.eup %993 }
 0x3a7   :  { %477 = vadd.xlane.f32.xlu1 %v476_v50  ;;  %v473_v55 = vsel %vm406_vm2, %v994_v54, 0.0 }
 0x3af   :  { %800 = vrot.lane.b32.xlu2 %v1252_v33, %s1110_s19 }
 0x3b3   :  { %648 = vrot.lane.b32.xlu0 %v1243_v29, %s1112_s5 }
 0x3c0   :  { %850 = vrot.lane.b32.xlu1 %v1252_v33, %s1112_s5  ;;  %v644_v33 = vpop.f32.mrf.mxu2 }
 0x3c8   :  { %v751_v0 = vpop.f32.mrf.mxu2 }
 0x3dd   :  { %474 = vadd.xlane.f32.xlu0 %v473_v55 }
 0x3eb   :  { %v570_v11 = vpop.f32.mrf.mxu3 }
 0x3ec   :  { %v594_v7 = vadd.f32 %v593_v17, %v570_v11 }
 0x3ee   :  { %v647_v18 = vadd.f32 %v644_v33, %v594_v7 }
 0x40a   :  { %v466_v56 = vpop.xlane.xlu2 %465 }
 0x412   :  { %v801_v57 = vpop.permute.xlu2 %800  ;;  %v469_v58 = vpop.xlane.xlu0 %468 }
 0x413   :  { %995 = vrcp.f32 %v469_v58  ;;  %821 = vmatpush.msrb.mxu1 %v801_v57 }
 0x414   :  { %997 = vrcp.f32 %v466_v56 }
 0x419   :  { %v996_v59 = vpop.eup %995 }
 0x41a   :  { %v491_v60 = vmul.f32 %v996_v59, %v990_v46  ;;  %v998_v29 = vpop.eup %997  ;;  %v478_v63 = vpop.xlane.xlu1 %477 }
 0x41b   :  { %v490_v61 = vmul.f32 %v998_v29, %v988_v41  ;;  %999 = vrcp.f32 %v478_v63 }
 0x41c   :  { %953 = vmatmul.msk.f32.vlgmr.msra.gmra.mxu1 %vm406_vm2, %v491_v60 }
 0x421   :  { %v1000_v1 = vpop.eup %999 }
 0x422   :  { %v494_v3 = vmul.f32 %v1000_v1, %v992_v49 }
 0x425   :  { %v649_v62 = vpop.permute.xlu0 %648 }
 0x426   :  { %669 = vmatpush.msrb.mxu3 %v649_v62 }
 0x427   :  { %951 = vmatmul.msk.f32.vlgmr.msrb.gmra.mxu3 %vm406_vm2, %v490_v61 }
 0x428   :  { %771 = vmatpush.msra.mxu3 %v1311_v22 }
 0x42a   :  { %772 = vmatpush.msra.mxu3 %v548_v34 }
 0x42f   :  { %955 = vmatmul.msk.f32.vlgmr.msra.gmra.mxu3 %vm185_vm1, %v751_v0 }
 0x432   :  { %v851_v2 = vpop.permute.xlu1 %850 }
 0x433   :  { %871 = vmatpush.msrb.mxu3 %v851_v2 }
 0x437   :  { %959 = vmatmul.msk.f32.vlgmr.msrb.gmra.mxu3 %vm406_vm2, %v494_v3 }
 0x450   :  { %v475_v4 = vpop.xlane.xlu0 %474 }
 0x451   :  { %1001 = vrcp.f32 %v475_v4 }
 0x457   :  { %v1002_v5 = vpop.eup %1001 }
 0x458   :  { %v493_v6 = vmul.f32 %v1002_v5, %v994_v54 }
 0x45a   :  { %957 = vmatmul.msk.f32.vlgmr.msrb.gmra.mxu1 %vm406_vm2, %v493_v6 }
 0x499   :  { %v724_v13 = vpop.f32.mrf.mxu1 }
 0x4aa   :  { %v671_v12 = vpop.f32.mrf.mxu3 }
 0x4ab   :  { %952 = vmatmul.msk.f32.vlgmr.msra.gmra.mxu0 %vm185_vm1, %v671_v12 }
 0x4ac   :  { %893 = vmatpush.msra.mxu0 %v675_v8 }
 0x4ae   :  { %894 = vmatpush.msra.mxu0 %v674_v9 }
 0x4b2   :  { %v774_v14 = vpop.f32.mrf.mxu3 }
 0x4b3   :  { %956 = vmatmul.msk.f32.vlgmr.msrb.gmra.mxu0 %vm185_vm1, %v724_v13 }
 0x4ba   :  { %v873_v15 = vpop.f32.mrf.mxu3 }
 0x4bb   :  { %960 = vmatmul.msk.f32.vlgmr.msra.gmra.mxu0 %vm185_vm1, %v873_v15 }
 0x4d7   :  { %v823_v16 = vpop.f32.mrf.mxu1 }
 0x4d8   :  { %958 = vmatmul.msk.f32.vlgmr.msrb.gmra.mxu2 %vm185_vm1, %v823_v16 }
 0x528   :  { %v696_v19 = vpop.f32.mrf.mxu0 }
 0x529   :  { %v699_v20 = vadd.f32 %v696_v19, %v647_v18 }
 0x52b   :  { %v703_v21 = vadd.f32 %v970_v10, %v699_v20 }
 0x52d   :  { %901 = vst.msk [vmem:[#allocation8] sm:$0xff] %vm87_vm0, %v703_v21 }
 0x530   :  { %v797_v22 = vpop.f32.mrf.mxu0 }
 0x531   :  { %v798_v23 = vadd.f32 %v797_v22, %v774_v14 }
 0x538   :  { %v896_v26 = vpop.f32.mrf.mxu0 }
 0x55b   :  { %v846_v24 = vpop.f32.mrf.mxu2 }
 0x55c   :  { %v849_v25 = vadd.f32 %v846_v24, %v798_v23 }
 0x55e   :  { %v899_v27 = vadd.f32 %v896_v26, %v849_v25 }
 0x560   :  { %v900_v28 = vadd.f32 %v970_v10, %v899_v27 }
 0x562   :  { %902 = vst.msk [vmem:[#allocation8 + $0x8] sm:$0xff] %vm87_vm0, %v900_v28 }
 0x563   :  { %915 = dma.vmem_to_hbm [thread:$0]  %s908_s16, 256, %s910_s1, [#allocation4], %s1106_s13, %s1106_s13, %s1107_s14  }
 0x564   :  { %1103 = dma.done.wait [#allocation4], 256  }
 0x565   :  { %1104 = vsyncadd [#allocation4], 4294967040 }
 0x566   :  { %920 = vsyncpa [#allocation3], 1 }
 0x567   :  { %921 = vsyncpa [#allocation6], 1 }
 0x568   :  { %922 = vsyncpa [#allocation4], 1 }

</bundles_post_ra>
